<compile_context>
chip_gen: v5e
topology: v5e:2x2
jax: 0.10.0
libtpu: 0.0.40
codegen_flags: <defaults>
</compile_context>

<pallas_src>
import functools
import numpy as np
import jax
import jax.numpy as jnp
from jax.experimental import pallas as pl
from jax.experimental.pallas import tpu as pltpu


# ----------------------------- helpers -----------------------------

def _round_up(x, m):
    return ((x + m - 1) // m) * m


def _pad_k(K):
    """K padding rule shared by weight prep and the matmul wrapper."""
    if K <= 512:
        kp = _round_up(K, 128)
        return kp, kp          # single K step
    kp = _round_up(K, 256)
    return kp, 256             # 256-wide K reduction tiles


def _tk_for(Kp):
    if Kp <= 512:
        return Kp
    return 256 if Kp % 256 == 0 else 128


def _pad_n(N):
    return _round_up(N, 128)


def _pick_tm(M):
    m8 = _round_up(M, 8)
    for tm in (256, 128, 64, 32, 16, 8):
        if m8 >= tm:
            return tm
    return 8


_CONST_CACHE = {}


def _const_vec(n, val):
    key = (n, float(val))
    if key not in _CONST_CACHE:
        _CONST_CACHE[key] = jnp.full((1, n), val, jnp.float32)
    return _CONST_CACHE[key]


# ----------------------------- Pallas kernels -----------------------------

def _mm_kernel(a_ref, b_ref, sa_ref, ba_ref, so_ref, bo_ref, o_ref, acc_ref, *,
               pre_affine, pre_relu, post_relu):
    # out = post_affine( pre_affine(A) @ B ), K tiled over grid axis 1, f32 accumulation.
    k = pl.program_id(1)

    @pl.when(k == 0)
    def _():
        acc_ref[...] = jnp.zeros_like(acc_ref)

    a = a_ref[...]                                   # (TM, TK) bf16
    if pre_affine or pre_relu:
        a = a.astype(jnp.float32)
        if pre_affine:
            a = a * sa_ref[...] + ba_ref[...]        # (1, TK) broadcast
        if pre_relu:
            a = jnp.maximum(a, 0.0)
        a = a.astype(jnp.bfloat16)
    acc_ref[...] += jnp.dot(a, b_ref[...], preferred_element_type=jnp.float32)

    @pl.when(k == pl.num_programs(1) - 1)
    def _():
        y = acc_ref[...] * so_ref[...] + bo_ref[...]  # (1, Np) broadcast
        if post_relu:
            y = jnp.maximum(y, 0.0)
        o_ref[...] = y.astype(o_ref.dtype)


def _pool_kernel(x_ref, o_ref, *, op):
    # x: (n_windows, TM, C) -> reduce over window axis (f32 math, bf16 out).
    x = x_ref[...].astype(jnp.float32)
    r = jnp.max(x, axis=0) if op == "max" else jnp.mean(x, axis=0)
    o_ref[...] = r.astype(o_ref.dtype)


def _head_kernel(x_ref, s_ref, b_ref, w_ref, cb_ref, o_ref):
    # Fused tail: norm5 + ReLU + global average pool + classifier matmul + bias.
    x = x_ref[...].astype(jnp.float32)                         # (HW, Bp, C)
    x = jnp.maximum(x * s_ref[...] + b_ref[...], 0.0)          # (1, 1, C) broadcast
    pooled = jnp.mean(x, axis=0)                               # (Bp, C)
    y = jnp.dot(pooled.astype(jnp.bfloat16), w_ref[...],
                preferred_element_type=jnp.float32)
    o_ref[...] = y + cb_ref[...]


# ----------------------------- kernel wrappers -----------------------------

def matmul_fused(a, w_pad, n_out, *, pre_scale=None, pre_shift=None, pre_relu=False,
                 post_scale=None, post_shift=None, post_relu=False,
                 out_dtype=jnp.bfloat16):
    """Fused (affine+ReLU) -> K-tiled bf16 matmul (f32 acc) -> (affine+ReLU).

    w_pad: pre-padded bf16 weight of shape (Kp, Np); zero rows/cols keep the padding exact.
    pre_* must be pre-padded to (1, Kp); post_* to (1, Np)."""
    M, K = a.shape
    Kp, Np = w_pad.shape
    assert Kp >= K and Kp == _pad_k(K)[0], (K, Kp)
    TK = _tk_for(Kp)
    TM = _pick_tm(M)
    Mp = _round_up(M, TM)

    pre_affine = pre_scale is not None
    sa = pre_scale if pre_affine else _const_vec(Kp, 1.0)
    ba = pre_shift if pre_affine else _const_vec(Kp, 0.0)
    so = post_scale if post_scale is not None else _const_vec(Np, 1.0)
    bo = post_shift if post_shift is not None else _const_vec(Np, 0.0)

    a_p = jnp.pad(a.astype(jnp.bfloat16), ((0, Mp - M), (0, Kp - K)))

    out = pl.pallas_call(
        functools.partial(_mm_kernel, pre_affine=pre_affine,
                          pre_relu=pre_relu, post_relu=post_relu),
        out_shape=jax.ShapeDtypeStruct((Mp, Np), out_dtype),
        grid_spec=pltpu.PrefetchScalarGridSpec(
            num_scalar_prefetch=0,
            grid=(Mp // TM, Kp // TK),
            in_specs=[
                pl.BlockSpec((TM, TK), lambda i, k: (i, k)),
                pl.BlockSpec((TK, Np), lambda i, k: (k, 0)),
                pl.BlockSpec((1, TK), lambda i, k: (0, k)),
                pl.BlockSpec((1, TK), lambda i, k: (0, k)),
                pl.BlockSpec((1, Np), lambda i, k: (0, 0)),
                pl.BlockSpec((1, Np), lambda i, k: (0, 0)),
            ],
            out_specs=pl.BlockSpec((TM, Np), lambda i, k: (i, 0)),
            scratch_shapes=[pltpu.VMEM((TM, Np), jnp.float32)],
        ),
        compiler_params=pltpu.CompilerParams(
            dimension_semantics=("parallel", "arbitrary")),
    )(a_p, w_pad, sa, ba, so, bo)
    return out[:M, :n_out]


def pool_reduce(stacked, op, out_dtype=jnp.bfloat16):
    """stacked: (n_windows, M, C) -> (M, C) max/mean reduction, tiled over M."""
    Wn, M, C = stacked.shape
    TM = 512 if M >= 512 else _round_up(M, 8)
    Mp = _round_up(M, TM)
    x = jnp.pad(stacked, ((0, 0), (0, Mp - M), (0, 0)))
    out = pl.pallas_call(
        functools.partial(_pool_kernel, op=op),
        out_shape=jax.ShapeDtypeStruct((Mp, C), out_dtype),
        grid_spec=pltpu.PrefetchScalarGridSpec(
            num_scalar_prefetch=0, grid=(Mp // TM,),
            in_specs=[pl.BlockSpec((Wn, TM, C), lambda i: (0, i, 0))],
            out_specs=pl.BlockSpec((TM, C), lambda i: (i, 0)),
        ),
        compiler_params=pltpu.CompilerParams(dimension_semantics=("parallel",)),
    )(x)
    return out[:M]


def head_fused(x_nhwc, scale, shift, w_pad, bias_pad, n_out):
    """norm5 + ReLU + adaptive avg pool (1,1) + Linear, in one kernel."""
    B, H, W, C = x_nhwc.shape
    HW = H * W
    Bp = _round_up(B, 8)
    x = jnp.transpose(x_nhwc.reshape(B, HW, C), (1, 0, 2))      # (HW, B, C)
    x = jnp.pad(x, ((0, 0), (0, Bp - B), (0, 0)))
    Np = w_pad.shape[1]
    out = pl.pallas_call(
        _head_kernel,
        out_shape=jax.ShapeDtypeStruct((Bp, Np), jnp.float32),
        grid_spec=pltpu.PrefetchScalarGridSpec(
            num_scalar_prefetch=0, grid=(1,),
            in_specs=[pl.BlockSpec((HW, Bp, C), lambda i: (0, 0, 0)),
                      pl.BlockSpec((1, 1, C), lambda i: (0, 0, 0)),
                      pl.BlockSpec((1, 1, C), lambda i: (0, 0, 0)),
                      pl.BlockSpec((C, Np), lambda i: (0, 0)),
                      pl.BlockSpec((1, Np), lambda i: (0, 0))],
            out_specs=pl.BlockSpec((Bp, Np), lambda i: (0, 0)),
        ),
    )(x, scale.reshape(1, 1, C), shift.reshape(1, 1, C), w_pad, bias_pad)
    return out[:B, :n_out]


# ----------------------------- conv / pool glue (im2col, layout only) -----------------------------

def _extract_windows_2d(x, kh, kw, stride, pad, pad_value=0.0):
    B, H, W, C = x.shape
    Ho = (H + 2 * pad - kh) // stride + 1
    Wo = (W + 2 * pad - kw) // stride + 1
    xp = jnp.pad(x, ((0, 0), (pad, pad), (pad, pad), (0, 0)), constant_values=pad_value)
    wins = []
    for i in range(kh):
        for j in range(kw):
            wins.append(xp[:, i:i + (Ho - 1) * stride + 1:stride,
                           j:j + (Wo - 1) * stride + 1:stride, :])
    return jnp.stack(wins, axis=0), Ho, Wo            # (kh*kw, B, Ho, Wo, C)


def conv2d_fused(x, w_pad, n_out, kh, kw, stride, pad, **fuse):
    # TODO(synk): im2col still materializes a kh*kw-inflated (bf16) patch tensor in HBM; a
    # halo-aware BlockSpec conv kernel would remove this last major HBM-traffic overhead.
    B, H, W, C = x.shape
    wins, Ho, Wo = _extract_windows_2d(x, kh, kw, stride, pad)
    patches = jnp.transpose(wins, (1, 2, 3, 0, 4)).reshape(B * Ho * Wo, kh * kw * C)
    y = matmul_fused(patches, w_pad, n_out, **fuse)
    return y.reshape(B, Ho, Wo, n_out)


def pool2d(x, k, stride, pad, op):
    # zero padding is exact for max-pool here because the input is post-ReLU (>= 0).
    B, H, W, C = x.shape
    wins, Ho, Wo = _extract_windows_2d(x, k, k, stride, pad, pad_value=0.0)
    stacked = wins.reshape(k * k, B * Ho * Wo, C)
    return pool_reduce(stacked, op).reshape(B, Ho, Wo, C)


def conv3d_collapse_time(x, w_pad, n_out, kt, pad_hw, **fuse):
    # x: (B, T, H, W, C); kernel (kt, 3, 3), stride 1, padding (0, pad_hw, pad_hw) -> T collapses.
    B, T, H, W, C = x.shape
    To = T - kt + 1
    xp = jnp.pad(x, ((0, 0), (0, 0), (pad_hw, pad_hw), (pad_hw, pad_hw), (0, 0)))
    wins = []
    for t in range(kt):
        for i in range(3):
            for j in range(3):
                wins.append(xp[:, t:t + To, i:i + H, j:j + W, :])
    stacked = jnp.stack(wins, axis=0)                  # (kt*9, B, To, H, W, C)
    patches = jnp.transpose(stacked, (1, 2, 3, 4, 0, 5)).reshape(B * To * H * W, kt * 9 * C)
    y = matmul_fused(patches, w_pad, n_out, **fuse)
    return y.reshape(B, To, H, W, n_out)


# ----------------------------- deterministic parameter construction -----------------------------

_BLOCK_CONFIG = (6, 12, 32, 32)    # DenseNet-169
_GROWTH = 32
_BN_SIZE = 4
_NUM_INIT = 64


class _ParamGen:
    def __init__(self, seed=0):
        self.key = jax.random.PRNGKey(seed)

    def next(self):
        self.key, k = jax.random.split(self.key)
        return k

    def conv(self, k_in, c_out):
        # He init, fan_in = Cin*KH*KW.  Pre-padded to (Kp, Np) and pre-cast to bf16 ONCE here so
        # the forward pass never pads or re-casts a weight.
        std = float(np.sqrt(2.0 / k_in))
        w = std * jax.random.normal(self.next(), (k_in, c_out), jnp.float32)
        kp, _ = _pad_k(k_in)
        npd = _pad_n(c_out)
        return jnp.pad(w, ((0, kp - k_in), (0, npd - c_out))).astype(jnp.bfloat16)

    def bn(self, c, pad_to=None):
        # Eval-mode BatchNorm folded into a per-channel affine:
        #   scale = gamma / sqrt(running_var + eps), shift = beta - running_mean * scale
        s = 0.8 + 0.4 * jax.random.uniform(self.next(), (c,), dtype=jnp.float32)
        b = 0.05 * jax.random.normal(self.next(), (c,), jnp.float32)
        if pad_to is not None:
            s = jnp.pad(s, (0, pad_to - c))
            b = jnp.pad(b, (0, pad_to - c))
        return s.reshape(1, -1), b.reshape(1, -1)


def init_params(in_channels=3, in_times=5, features=(128,), nlastlayer=1):
    g = _ParamGen(0)
    p = {}
    f_last = features[-1]
    # Downto2D (approx): Conv3d(in_channels, f_last, (in_times,3,3), padding=(0,1,1)) + BN3d + ReLU
    p["down_conv_w"] = g.conv(in_times * 9 * in_channels, f_last)
    p["down_bn_s"], p["down_bn_b"] = g.bn(f_last, pad_to=_pad_n(f_last))
    # DenseNet-169 features, conv0 replaced: Conv2d(f_last, 64, 7, stride=2, pad=3, bias=False)
    p["conv0_w"] = g.conv(7 * 7 * f_last, _NUM_INIT)
    p["norm0_s"], p["norm0_b"] = g.bn(_NUM_INIT, pad_to=_pad_n(_NUM_INIT))
    nf = _NUM_INIT
    for bi, nl in enumerate(_BLOCK_CONFIG):
        for li in range(nl):
            cin = nf + li * _GROWTH
            lp = {}
            kp1, _ = _pad_k(cin)
            lp["norm1_s"], lp["norm1_b"] = g.bn(cin, pad_to=kp1)               # prologue of 1x1
            lp["conv1_w"] = g.conv(cin, _BN_SIZE * _GROWTH)
            lp["norm2_s"], lp["norm2_b"] = g.bn(_BN_SIZE * _GROWTH,
                                                pad_to=_pad_n(_BN_SIZE * _GROWTH))  # epilogue of 1x1
            lp["conv2_w"] = g.conv(9 * _BN_SIZE * _GROWTH, _GROWTH)
            p[f"db{bi}_l{li}"] = lp
        nf = nf + nl * _GROWTH
        if bi != len(_BLOCK_CONFIG) - 1:
            tp = {}
            kpt, _ = _pad_k(nf)
            tp["norm_s"], tp["norm_b"] = g.bn(nf, pad_to=kpt)                  # prologue of trans 1x1
            tp["conv_w"] = g.conv(nf, nf // 2)
            p[f"trans{bi}"] = tp
            nf = nf // 2
    p["norm5_s"], p["norm5_b"] = g.bn(nf)                       # nf == 1664 (classifier.in_features)
    cls = float(1.0 / np.sqrt(nf)) * jax.random.normal(g.next(), (nf, nlastlayer), jnp.float32)
    p["cls_w"] = jnp.pad(cls, ((0, 0), (0, _pad_n(nlastlayer) - nlastlayer))).astype(jnp.bfloat16)
    p["cls_b"] = jnp.zeros((1, _pad_n(nlastlayer)), jnp.float32)
    return p


# ----------------------------- full forward pass -----------------------------

def regression_resnet_forward(x_ncdhw, params, in_times=5, features=(128,), nlastlayer=1):
    f_last = features[-1]
    # ---- Downto2D ----
    # TODO(synk): exact Downto2D/Block3DConv source was not provided; approximated as a single
    # Conv3d(kernel=(in_times,3,3), padding=(0,1,1)) + BatchNorm3d + ReLU that collapses T -> 1
    # (dropout is identity in eval mode).
    x = jnp.transpose(x_ncdhw, (0, 2, 3, 4, 1)).astype(jnp.bfloat16)    # (B, T, H, W, C)
    x = conv3d_collapse_time(
        x, params["down_conv_w"], f_last, in_times, 1,
        post_scale=params["down_bn_s"], post_shift=params["down_bn_b"], post_relu=True)
    x = x[:, 0]                                                         # (B, H, W, f_last) NHWC

    # ---- DenseNet-169 feature extractor (eval BN folded into the matmul kernels, bf16 MXU) ----
    x = conv2d_fused(x, params["conv0_w"], _NUM_INIT, 7, 7, 2, 3,
                     post_scale=params["norm0_s"], post_shift=params["norm0_b"], post_relu=True)
    x = pool2d(x, 3, 2, 1, "max")                                       # maxpool 3x3 s2 p1
    nf = _NUM_INIT
    for bi, nl in enumerate(_BLOCK_CONFIG):
        for li in range(nl):
            lp = params[f"db{bi}_l{li}"]
            # norm1+relu1 fused as prologue (1x1 conv, no padding), norm2+relu2 fused as epilogue.
            # TODO(synk): the 1x1 bottleneck + 3x3 conv could be fused into one kernel keeping the
            # bottleneck activation in VMEM; kept as two launches here.
            bottleneck = conv2d_fused(
                x, lp["conv1_w"], _BN_SIZE * _GROWTH, 1, 1, 1, 0,
                pre_scale=lp["norm1_s"], pre_shift=lp["norm1_b"], pre_relu=True,
                post_scale=lp["norm2_s"], post_shift=lp["norm2_b"], post_relu=True)
            new_features = conv2d_fused(bottleneck, lp["conv2_w"], _GROWTH, 3, 3, 1, 1)
            x = jnp.concatenate([x, new_features], axis=-1)
        nf = nf + nl * _GROWTH
        if bi != len(_BLOCK_CONFIG) - 1:
            tp = params[f"trans{bi}"]
            x = conv2d_fused(x, tp["conv_w"], nf // 2, 1, 1, 1, 0,
                             pre_scale=tp["norm_s"], pre_shift=tp["norm_b"], pre_relu=True)
            x = pool2d(x, 2, 2, 0, "avg")
            nf = nf // 2

    # ---- fused tail: norm5 + ReLU + adaptive avg pool (1,1) + flatten + classifier ----
    out = head_fused(x, params["norm5_s"], params["norm5_b"],
                     params["cls_w"], params["cls_b"], nlastlayer)
    return out                                                          # (B, nlastlayer), f32


# ----------------------------- demo -----------------------------

if __name__ == "__main__":
    # Small shapes consistent with the module: batch=2, in_channels=3, in_times=5.
    # Spatial 32 is the smallest size that survives DenseNet-169's four downsampling stages.
    B, Cin, T, H, W = 2, 3, 5, 32, 32
    x = jax.random.normal(jax.random.PRNGKey(0), (B, Cin, T, H, W), jnp.float32)
    params = init_params(in_channels=Cin, in_times=T, features=(128,), nlastlayer=1)
    out = regression_resnet_forward(x, params, in_times=T, features=(128,), nlastlayer=1)
    out = jax.block_until_ready(out)
    assert out.shape == (B, 1), out.shape
    assert bool(jnp.all(jnp.isfinite(out)))
    print("KERNEL_OK")
</pallas_src>

<mosaic_0001>
module attributes {stable_mosaic.version = 11 : i64} {
  func.func @_mm_kernel(%arg0: i32, %arg1: i32, %arg2: memref<256x256xbf16, #tpu.memory_space<vmem>>, %arg3: memref<256x128xbf16, #tpu.memory_space<vmem>>, %arg4: memref<1x256xf32, #tpu.memory_space<vmem>>, %arg5: memref<1x256xf32, #tpu.memory_space<vmem>>, %arg6: memref<1x128xf32, #tpu.memory_space<vmem>>, %arg7: memref<1x128xf32, #tpu.memory_space<vmem>>, %arg8: memref<256x128xbf16, #tpu.memory_space<vmem>>, %arg9: memref<256x128xf32, #tpu.memory_space<vmem>>) attributes {dimension_semantics = [#tpu.dimension_semantics<parallel>, #tpu.dimension_semantics<arbitrary>], iteration_bounds = array<i64: 8, 1>, scalar_prefetch = 0 : i64, scratch_operands = 1 : i64, tpu.core_type = #tpu.core_type<tc>, window_params = [{transform_indices = @transform_0, window_bounds = array<i64: 256, 256>}, {transform_indices = @transform_1, window_bounds = array<i64: 256, 128>}, {transform_indices = @transform_2, window_bounds = array<i64: 1, 256>}, {transform_indices = @transform_3, window_bounds = array<i64: 1, 256>}, {pipeline_mode = #tpu.pipeline_mode<synchronous>, transform_indices = @transform_4, window_bounds = array<i64: 1, 128>}, {pipeline_mode = #tpu.pipeline_mode<synchronous>, transform_indices = @transform_5, window_bounds = array<i64: 1, 128>}, {transform_indices = @transform_6, window_bounds = array<i64: 256, 128>}]} {
    %c0_i32 = arith.constant 0 : i32
    %0 = arith.cmpi eq, %arg1, %c0_i32 : i32
    %1 = arith.extui %0 : i1 to i32
    %c0_i32_0 = arith.constant 0 : i32
    %2 = arith.cmpi ne, %1, %c0_i32_0 : i32
    scf.if %2 {
      %cst_10 = arith.constant 0.000000e+00 : f32
      %12 = vector.broadcast %cst_10 : f32 to vector<256x128xf32>
      %c0_11 = arith.constant 0 : index
      %c0_12 = arith.constant 0 : index
      %13 = vector.load %arg9[%c0_11, %c0_12] : memref<256x128xf32, #tpu.memory_space<vmem>>, vector<256x128xf32>
      tpu.vector_store %arg9[%c0_11, %c0_12], %12 {strides = array<i32>} : memref<256x128xf32, #tpu.memory_space<vmem>>, vector<256x128xf32>,
    } else {
    }
    %c0 = arith.constant 0 : index
    %c0_1 = arith.constant 0 : index
    %3 = vector.load %arg2[%c0, %c0_1] : memref<256x256xbf16, #tpu.memory_space<vmem>>, vector<256x256xbf16>
    %c0_2 = arith.constant 0 : index
    %c0_3 = arith.constant 0 : index
    %4 = vector.load %arg9[%c0_2, %c0_3] : memref<256x128xf32, #tpu.memory_space<vmem>>, vector<256x128xf32>
    %c0_4 = arith.constant 0 : index
    %c0_5 = arith.constant 0 : index
    %5 = vector.load %arg3[%c0_4, %c0_5] : memref<256x128xbf16, #tpu.memory_space<vmem>>, vector<256x128xbf16>
    %cst = arith.constant dense<0.000000e+00> : vector<256x128xf32>
    %6 = tpu.matmul %3, %5, %cst {dimension_numbers = #tpu.dot_dimension_numbers<[1], [0], [0], [1], [0, 0, 1, 1], [], []>} : vector<256x256xbf16>, vector<256x128xbf16>, vector<256x128xf32> -> vector<256x128xf32>
    %7 = arith.addf %4, %6 : vector<256x128xf32>
    %c0_6 = arith.constant 0 : index
    %c0_7 = arith.constant 0 : index
    %8 = vector.load %arg9[%c0_6, %c0_7] : memref<256x128xf32, #tpu.memory_space<vmem>>, vector<256x128xf32>
    tpu.vector_store %arg9[%c0_6, %c0_7], %7 {strides = array<i32>} : memref<256x128xf32, #tpu.memory_space<vmem>>, vector<256x128xf32>,
    %c0_i32_8 = arith.constant 0 : i32
    %9 = arith.cmpi eq, %arg1, %c0_i32_8 : i32
    %10 = arith.extui %9 : i1 to i32
    %c0_i32_9 = arith.constant 0 : i32
    %11 = arith.cmpi ne, %10, %c0_i32_9 : i32
    scf.if %11 {
      %c0_10 = arith.constant 0 : index
      %c0_11 = arith.constant 0 : index
      %12 = vector.load %arg9[%c0_10, %c0_11] : memref<256x128xf32, #tpu.memory_space<vmem>>, vector<256x128xf32>
      %c0_12 = arith.constant 0 : index
      %c0_13 = arith.constant 0 : index
      %13 = vector.load %arg6[%c0_12, %c0_13] : memref<1x128xf32, #tpu.memory_space<vmem>>, vector<1x128xf32>
      %14 = vector.broadcast %13 : vector<1x128xf32> to vector<256x128xf32>
      %15 = arith.mulf %12, %14 : vector<256x128xf32>
      %c0_14 = arith.constant 0 : index
      %c0_15 = arith.constant 0 : index
      %16 = vector.load %arg7[%c0_14, %c0_15] : memref<1x128xf32, #tpu.memory_space<vmem>>, vector<1x128xf32>
      %17 = vector.broadcast %16 : vector<1x128xf32> to vector<256x128xf32>
      %18 = arith.addf %15, %17 : vector<256x128xf32>
      %cst_16 = arith.constant 0.000000e+00 : f32
      %19 = vector.broadcast %cst_16 : f32 to vector<256x128xf32>
      %20 = arith.maximumf %18, %19 : vector<256x128xf32>
      %21 = arith.truncf %20 : vector<256x128xf32> to vector<256x128xbf16>
      %c0_17 = arith.constant 0 : index
      %c0_18 = arith.constant 0 : index
      %22 = vector.load %arg8[%c0_17, %c0_18] : memref<256x128xbf16, #tpu.memory_space<vmem>>, vector<256x128xbf16>
      tpu.vector_store %arg8[%c0_17, %c0_18], %21 {strides = array<i32>} : memref<256x128xbf16, #tpu.memory_space<vmem>>, vector<256x128xbf16>,
    } else {
    }
    return
  }
  func.func @transform_0(%arg0: i32, %arg1: i32) -> (i32, i32) {
    %c0_i32 = arith.constant 0 : i32
    return %arg0, %arg1 : i32, i32
  }
  func.func @transform_1(%arg0: i32, %arg1: i32) -> (i32, i32) {
    %c0_i32 = arith.constant 0 : i32
    %c0_i32_0 = arith.constant 0 : i32
    return %arg1, %c0_i32 : i32, i32
  }
  func.func @transform_2(%arg0: i32, %arg1: i32) -> (i32, i32) {
    %c0_i32 = arith.constant 0 : i32
    %c0_i32_0 = arith.constant 0 : i32
    return %c0_i32, %arg1 : i32, i32
  }
  func.func @transform_3(%arg0: i32, %arg1: i32) -> (i32, i32) {
    %c0_i32 = arith.constant 0 : i32
    %c0_i32_0 = arith.constant 0 : i32
    return %c0_i32, %arg1 : i32, i32
  }
  func.func @transform_4(%arg0: i32, %arg1: i32) -> (i32, i32) {
    %c0_i32 = arith.constant 0 : i32
    %c0_i32_0 = arith.constant 0 : i32
    %c0_i32_1 = arith.constant 0 : i32
    return %c0_i32, %c0_i32_0 : i32, i32
  }
  func.func @transform_5(%arg0: i32, %arg1: i32) -> (i32, i32) {
    %c0_i32 = arith.constant 0 : i32
    %c0_i32_0 = arith.constant 0 : i32
    %c0_i32_1 = arith.constant 0 : i32
    return %c0_i32, %c0_i32_0 : i32, i32
  }
  func.func @transform_6(%arg0: i32, %arg1: i32) -> (i32, i32) {
    %c0_i32 = arith.constant 0 : i32
    %c0_i32_0 = arith.constant 0 : i32
    return %arg0, %c0_i32 : i32, i32
  }
}

</mosaic_0001>

<bundles_post_ra>
// kernel: tpu_custom_call.1
= control target key start
LH: loop header
LB: loop body
LE: loop exit
PB: predicated region body
PF: predicated region fallthrough
CT: control target
= control target key end

     0   :  { %s2326_s0 = inlined_call_operand.hbm [shape: bf16[2048,256], index: 0, kind: input, shape index: {}]   ;;  %s2327_s1 = inlined_call_operand.hbm [shape: bf16[256,128], index: 1, kind: input, shape index: {}]   ;;  %s2328_s2 = inlined_call_operand.hbm [shape: f32[1,256], index: 2, kind: input, shape index: {}]   ;;  %s2329_s3 = inlined_call_operand.vmem [shape: f32[1,256], index: 3, kind: input, shape index: {}]   ;;  %s2330_s4 = inlined_call_operand.vmem [shape: f32[1,128], index: 4, kind: input, shape index: {}]   ;;  %s2331_s5 = inlined_call_operand.vmem [shape: f32[1,128], index: 5, kind: input, shape index: {}]   ;;  %s2332_s6 = inlined_call_operand.hbm [shape: bf16[2048,128], index: 6, kind: output, shape index: {}]  }
   0x1   :  { %2334 = sst [smem:[#allocation14_spill]] %s2327_s1 }
   0x2   :  { %2335 = sst [smem:[#allocation15_spill]] %s2328_s2 }
   0x3   :  { %11 = vsyncpa [#allocation4], 0 }
   0x4   :  { %13 = vsyncpa [#allocation4 + $0x1], 0 }
   0x5   :  { %14 = vsyncpa [#allocation7], 0 }
   0x6   :  { %15 = vsyncpa [#allocation5], 0 }
   0x7   :  { %17 = vsyncpa [#allocation5 + $0x1], 0  ;;  %s2014_s21 = smov 0   ;;  %s2016_s22 = smov 0  }
   0x8   :  { %s2018_s23 = smov 0   ;;  %s2020_s3 = smov 0  }
   0x9   :  { %s2022_s24 = smov 0   ;;  %s2024_s25 = smov 0  }
   0xa LB: > { %s1327_s26 = sadd.s32 4294967295, %s1969_s25   ;;  %s1328_s27 = sadd.s32 4294967294, %s1969_s25   ;;  %s1969_s25 = sphi %s2024_s25, %s23_s25   ;;  %s1965_s24 = sphi %s2022_s24, %s2351_s24   ;;  %s1961_s3 = sphi %s2020_s3, %s2350_s3   ;;  %s1957_s23 = sphi %s2018_s23, %s2349_s23   ;;  %s1953_s22 = sphi %s2016_s22, %s2348_s22   ;;  %s1949_s21 = sphi %s2014_s21, %s2347_s21  }
   0xb   : > { %p57_p0 = scmp.ne.s32.totalorder %s1953_s22, %s1949_s21  ;;  %p2048_p1 = scmp.eq.s32.totalorder %s1327_s26, 0 }
   0xc   : > { %p2052_p2 = scmp.eq.s32.totalorder %s1327_s26, 7  ;;  %p207_p3 = scmp.eq.s32.totalorder %s1328_s27, 7 }
   0xd   : > { %p2058_p4 = por %p2048_p1, %p57_p0  ;;  %p1329_p5 = scmp.ge.s32.totalorder %s1969_s25, 1 }
   0xe   : > { %p2063_p6 = por %p207_p3, %p57_p0  ;;  %p214_p7 = scmp.lt.s32.totalorder %s1969_s25, 9 }
   0xf   : > { %s2340_s1 = sld [smem:[#allocation14_spill]]  ;;  %s1971_s12 = smov [#allocation6]  }
  0x10   : > { %p2071_p8 = pnand %p1329_p5, %p214_p7  ;;  %s230_s13 = sshll.u32 %s1971_s12, 4  ;;  %s231_s13 = int_to_ptr.vmem [resolvable:$true] %s230_s13 }
  0x11   : > { %s2342_s2 = sld [smem:[#allocation15_spill]]  ;;  %s1972_s17 = smov 64  }
  0x12   : > { %p1714_p9 = pneg %p2071_p8  ;;  %s1973_s18 = smov 4  }
  0x13   : > { %s1974_s19 = smov [#allocation8]   ;;  %s35_s26 = sadd.s32 1, %s1965_s24 }
  0x14   : > { %p1715_p10 = pnand %p1714_p9, %p2048_p1  ;;  %s247_s20 = sshll.u32 %s1974_s19, 4  ;;  %s248_s20 = int_to_ptr.vmem [resolvable:$true] %s247_s20 }
  0x15   : > { %s228_s10 = sshll.u32 %s2340_s1, 4  ;;  %s44_s27 = sadd.s32 1, %s1957_s23  ;;  %s229_s10 = int_to_ptr.hbm [resolvable:$true] %s228_s10 }
  0x16   : > { %1717 = dma.hbm_to_vmem [thread:$0]  (!%p1715_p10), %s229_s10, 2048, %s231_s13, [#allocation7], %s1972_s17, %s1972_s17, %s1973_s18  }
  0x17   : > { %s245_s16 = sshll.u32 %s2342_s2, 4  ;;  %p37_p11 = scmp.ge.s32.totalorder %s35_s26, 8  ;;  %s246_s16 = int_to_ptr.hbm [resolvable:$true] %s245_s16 }
  0x18   : > { %1720 = dma.hbm_to_vmem [thread:$0]  (!%p1715_p10), %s246_s16, 32, %s248_s20, [#allocation7]  }
  0x19   : > { %p51_p12 = scmp.ne.s32.totalorder %s1957_s23, %s1953_s22  ;;  %p52_p13 = scmp.eq.s32.totalorder %s1969_s25, 0 }
  0x1a   : > { %p1731_p0 = scmp.lt.s32.totalorder %s1969_s25, 8  ;;  %s2353_s26 = smov (%p37_p11, %s35_s26), 0 }
  0x1b   : > { %2343 = sst [smem:[#allocation13_spill]] %s2353_s26  ;;  %p2090_p3 = por %p52_p13, %p51_p12 }
  0x1c   : > { %p2096_p5 = por %p2052_p2, %p51_p12  ;;  %s39_s10 = ssub.s32 %s1965_s24, %s2353_s26 }
  0x1d   : > { %s272_s12 = sand.u32 1, %s1957_s23   ;;  %p42_p7 = scmp.eq.s32.totalorder %s39_s10, 0 }
  0x1e   : > { %s1334_s13 = sshll.u32 %s272_s12, 8  ;;  %s1541_s14 = sshll.u32 %s1965_s24, 8 }
  0x1f   : > { %s2105_s15 = scalar_select %p42_p7, %s1957_s23, %s44_s27  }
  0x20   : > { %s284_s18 = scalar_lea.hbm %s2326_s0, %s1541_s14  ;;  %s276_s20 = scalar_lea.vmem [#allocation3], %s1334_s13 }
  0x21   : > { %s285_s19 = sshll.u32 %s284_s18, 4  ;;  %s287_s1 = sshll.u32 %s276_s20, 4  ;;  %s286_s19 = int_to_ptr.hbm [resolvable:$true] %s285_s19  ;;  %s288_s1 = int_to_ptr.vmem [resolvable:$true] %s287_s1 }
  0x22   : > { %p1722_p2 = pnand %p1731_p0, %p2090_p3  ;;  %s273_s29 = scalar_lea.sflag [#allocation4], %s272_s12 }
  0x23   : > { %s1975_s2 = smov 128   ;;  %s1976_s26 = smov 8  }
  0x24   : > { %1724 = dma.hbm_to_vmem [thread:$0]  (!%p1722_p2), %s286_s19, 4096, %s288_s1, %s273_s29, %s1975_s2, %s1975_s2, %s1976_s26  }
  0x25   : > { %299 = sbr.rel (%p2071_p8) target bundleno = 344 (0x158), region = 44  ;;  %s2117_s27 = sand.u32 (!%p2071_p8), 1, %s1953_s22  }
  0x26   : > { %s1339_s10 = sshll.u32 (!%p2071_p8), %s2117_s27, 8  ;;  %s302_s13 = scalar_lea.sflag (!%p2071_p8), [#allocation4], %s2117_s27 }
  0x27   : > { %s2121_s14 = scalar_lea.vmem (!%p2071_p8), [#allocation3], %s1339_s10 }
  0x2a   : > { %1936 = dma.done.wait (%p2058_p4), %s302_s13, 4096  }
  0x2b   : > { %1938 = vsyncadd (%p2058_p4), %s302_s13, 4294963200 }
  0x2c   : > { %1940 = dma.done.wait (%p2048_p1), [#allocation7], 2080  }
  0x2d   : > { %1942 = vsyncadd (%p2048_p1), [#allocation7], 4294965216  ;;  %v1581_v0 = vld [vmem:[#allocation6 + $0x38] sm:$0xff]  ;;  %v1580_v2 = vld [vmem:[#allocation6 + $0x30] sm:$0xff]  ;;  %s1342_s11 = sshll.u32 %s2117_s27, 7  ;;  %s1590_s8 = sshll.u32 %s1961_s3, 7 }
  0x2e   : > { %v1589_v1 = vld [vmem:[#allocation6 + $0x78] sm:$0xff]  ;;  %747 = vmatpush.bf16.msra.mxu0 %v1581_v0  ;;  %1686 = vmatpush.bf16.msra.mxu2 %v1581_v0  ;;  %v1588_v3 = vld [vmem:[#allocation6 + $0x70] sm:$0xff]  ;;  %v1579_v4 = vld [vmem:[#allocation6 + $0x28] sm:$0xff]  ;;  %s2213_s26 = scalar_lea.vmem [#allocation9], %s1342_s11  ;;  %s1204_s17 = scalar_lea.hbm %s2332_s6, %s1590_s8 }
  0x2f   : > { %836 = vmatpush.bf16.msra.mxu1 %v1589_v1  ;;  %1694 = vmatpush.bf16.msra.mxu3 %v1589_v1  ;;  %v1587_v5 = vld [vmem:[#allocation6 + $0x68] sm:$0xff]  ;;  %v1578_v6 = vld [vmem:[#allocation6 + $0x20] sm:$0xff]  ;;  %v1577_v8 = vld [vmem:[#allocation6 + $0x18] sm:$0xff]  ;;  %s1205_s3 = sshll.u32 %s2213_s26, 4  ;;  %s1207_s18 = sshll.u32 %s1204_s17, 4  ;;  %s1206_s3 = int_to_ptr.vmem [resolvable:$true] %s1205_s3  ;;  %s1208_s18 = int_to_ptr.hbm [resolvable:$true] %s1207_s18 }
  0x30   : > { %v1586_v7 = vld [vmem:[#allocation6 + $0x60] sm:$0xff]  ;;  %v1585_v9 = vld [vmem:[#allocation6 + $0x58] sm:$0xff]  ;;  %v1576_v10 = vld [vmem:[#allocation6 + $0x10] sm:$0xff]  ;;  %s1193_s19 = scalar_lea.sflag [#allocation5], %s2117_s27  ;;  %s1897_s20 = sshra.s32 %s1208_s18, 4  ;;  %s1898_s20 = int_to_ptr.hbm [resolvable:$true] %s1897_s20 }
  0x31   : > { %v1584_v11 = vld [vmem:[#allocation6 + $0x50] sm:$0xff]  ;;  %v1575_v12 = vld [vmem:[#allocation6 + $0x8] sm:$0xff]  ;;  %v1574_v14 = vld [vmem:[#allocation6] sm:$0xff]  ;;  %s1899_s29 = scalar_lea.hbm %s1898_s20, 128  ;;  %p1904_p9 = scmp.lt.s32.totalorder %s1898_s20, %s2332_s6 }
  0x32   : > { %748 = vmatpush.bf16.msra.mxu0 %v1580_v2  ;;  %1687 = vmatpush.bf16.msra.mxu2 %v1580_v2  ;;  %v1583_v13 = vld [vmem:[#allocation6 + $0x48] sm:$0xff]  ;;  %v1582_v15 = vld [vmem:[#allocation6 + $0x40] sm:$0xff]  ;;  %v1353_v28 = vld [vmem:[%s2121_s14 + $0x10] sm:$0xf]  ;;  %p1900_p1 = scmp.ne.s32.totalorder %s1898_s20, %s1899_s29 }
  0x33   : > { %837 = vmatpush.bf16.msra.mxu1 %v1588_v3  ;;  %1695 = vmatpush.bf16.msra.mxu3 %v1588_v3  ;;  %v1345_v16 = vld [vmem:[%s2121_s14] sm:$0xf]  ;;  %v1543_v17 = vld [vmem:[%s2121_s14 + $0x4] sm:$0xf0]  ;;  %v1542_v20 = vld [vmem:[%s2121_s14 + $0x4] sm:$0xf] }
  0x34   : > { %v1409_v18 = vld [vmem:[%s2121_s14 + $0x80] sm:$0xf]  ;;  %v1559_v19 = vld [vmem:[%s2121_s14 + $0x84] sm:$0xf0]  ;;  %v1347_v21 = vld [vmem:[%s2121_s14 + $0x8] sm:$0xf0]  ;;  %v1346_v24 = vor.u32 %v1543_v17, %v1345_v16  ;;  %p1901_p4 = pnand %p1900_p1, %p2096_p5 }
  0x35   : > { %v1558_v22 = vld [vmem:[%s2121_s14 + $0x84] sm:$0xf]  ;;  %v1411_v23 = vld [vmem:[%s2121_s14 + $0x88] sm:$0xf0]  ;;  %v1410_v25 = vor.u32 %v1559_v19, %v1409_v18  ;;  %v1350_v26 = vor.u32 %v1542_v20, %v1347_v21  ;;  %v1545_v29 = vld [vmem:[%s2121_s14 + $0x14] sm:$0xf0] }
  0x36   : > { %749 = vmatpush.bf16.msra.mxu0 %v1579_v4  ;;  %1688 = vmatpush.bf16.msra.mxu2 %v1579_v4  ;;  %v1414_v27 = vor.u32 %v1558_v22, %v1411_v23  ;;  %v1417_v30 = vld [vmem:[%s2121_s14 + $0x90] sm:$0xf]  ;;  %v1561_v31 = vld [vmem:[%s2121_s14 + $0x94] sm:$0xf0]  ;;  %v1544_v32 = vld [vmem:[%s2121_s14 + $0x14] sm:$0xf]  ;;  %v1354_v36 = vor.u32 %v1545_v29, %v1353_v28  ;;  %p1902_p8 = pneg %p1901_p4 }
  0x37   : > { %838 = vmatpush.bf16.msra.mxu1 %v1587_v5  ;;  %1696 = vmatpush.bf16.msra.mxu3 %v1587_v5  ;;  %v1355_v33 = vld [vmem:[%s2121_s14 + $0x18] sm:$0xf0]  ;;  %v1560_v34 = vld [vmem:[%s2121_s14 + $0x94] sm:$0xf]  ;;  %v1418_v37 = vor.u32 %v1561_v31, %v1417_v30  ;;  %v1361_v40 = vld [vmem:[%s2121_s14 + $0x20] sm:$0xf] }
  0x38   : > { %v1419_v35 = vld [vmem:[%s2121_s14 + $0x98] sm:$0xf0]  ;;  %v1358_v38 = vor.u32 %v1544_v32, %v1355_v33  ;;  %v1547_v41 = vld [vmem:[%s2121_s14 + $0x24] sm:$0xf0]  ;;  %v1425_v42 = vld [vmem:[%s2121_s14 + $0xa0] sm:$0xf] }
  0x39   : > { %v1422_v39 = vor.u32 %v1560_v34, %v1419_v35  ;;  %v1563_v43 = vld [vmem:[%s2121_s14 + $0xa4] sm:$0xf0]  ;;  %v1546_v44 = vld [vmem:[%s2121_s14 + $0x24] sm:$0xf]  ;;  %v1363_v45 = vld [vmem:[%s2121_s14 + $0x28] sm:$0xf0]  ;;  %v1362_v48 = vor.u32 %v1547_v41, %v1361_v40 }
  0x3a   : > { %750 = vmatpush.bf16.msra.mxu0 %v1578_v6  ;;  %1689 = vmatpush.bf16.msra.mxu2 %v1578_v6  ;;  %v1562_v46 = vld [vmem:[%s2121_s14 + $0xa4] sm:$0xf]  ;;  %v1427_v47 = vld [vmem:[%s2121_s14 + $0xa8] sm:$0xf0]  ;;  %v1426_v49 = vor.u32 %v1563_v43, %v1425_v42  ;;  %v1366_v50 = vor.u32 %v1546_v44, %v1363_v45  ;;  %v1369_v52 = vld [vmem:[%s2121_s14 + $0x30] sm:$0xf] }
  0x3b   : > { %839 = vmatpush.bf16.msra.mxu1 %v1586_v7  ;;  %1697 = vmatpush.bf16.msra.mxu3 %v1586_v7  ;;  %v1430_v51 = vor.u32 %v1562_v46, %v1427_v47  ;;  %v1549_v53 = vld [vmem:[%s2121_s14 + $0x34] sm:$0xf0]  ;;  %v1433_v54 = vld [vmem:[%s2121_s14 + $0xb0] sm:$0xf]  ;;  %v1548_v56 = vld [vmem:[%s2121_s14 + $0x34] sm:$0xf] }
  0x3c   : > { %v1565_v55 = vld [vmem:[%s2121_s14 + $0xb4] sm:$0xf0]  ;;  %v1371_v57 = vld [vmem:[%s2121_s14 + $0x38] sm:$0xf0]  ;;  %v1564_v58 = vld [vmem:[%s2121_s14 + $0xb4] sm:$0xf]  ;;  %v1370_v60 = vor.u32 %v1549_v53, %v1369_v52 }
  0x3d   : > { %v1435_v59 = vld [vmem:[%s2121_s14 + $0xb8] sm:$0xf0]  ;;  %v1434_v61 = vor.u32 %v1565_v55, %v1433_v54  ;;  %v1374_v62 = vor.u32 %v1548_v56, %v1371_v57  ;;  %v1377_v0 = vld [vmem:[%s2121_s14 + $0x40] sm:$0xf]  ;;  %v1551_v1 = vld [vmem:[%s2121_s14 + $0x44] sm:$0xf0] }
  0x3e   : > { %751 = vmatpush.bf16.msra.mxu0 %v1577_v8  ;;  %1690 = vmatpush.bf16.msra.mxu2 %v1577_v8  ;;  %v1438_v63 = vor.u32 %v1564_v58, %v1435_v59  ;;  %v1441_v2 = vld [vmem:[%s2121_s14 + $0xc0] sm:$0xf]  ;;  %v1567_v3 = vld [vmem:[%s2121_s14 + $0xc4] sm:$0xf0]  ;;  %v1550_v4 = vld [vmem:[%s2121_s14 + $0x44] sm:$0xf]  ;;  %v1378_v8 = vor.u32 %v1551_v1, %v1377_v0 }
  0x3f   : > { %840 = vmatpush.bf16.msra.mxu1 %v1585_v9  ;;  %1698 = vmatpush.bf16.msra.mxu3 %v1585_v9  ;;  %v1379_v5 = vld [vmem:[%s2121_s14 + $0x48] sm:$0xf0]  ;;  %v1566_v6 = vld [vmem:[%s2121_s14 + $0xc4] sm:$0xf]  ;;  %v1442_v9 = vor.u32 %v1567_v3, %v1441_v2  ;;  %v1552_v16 = vld [vmem:[%s2121_s14 + $0x54] sm:$0xf] }
  0x40   : > { %v1443_v7 = vld [vmem:[%s2121_s14 + $0xc8] sm:$0xf0]  ;;  %v1387_v17 = vld [vmem:[%s2121_s14 + $0x58] sm:$0xf0]  ;;  %v1568_v18 = vld [vmem:[%s2121_s14 + $0xd4] sm:$0xf] }
  0x41   : > { %v1451_v19 = vld [vmem:[%s2121_s14 + $0xd8] sm:$0xf0]  ;;  %v1390_v22 = vor.u32 %v1552_v16, %v1387_v17  ;;  %v1554_v28 = vld [vmem:[%s2121_s14 + $0x64] sm:$0xf]  ;;  %v1395_v29 = vld [vmem:[%s2121_s14 + $0x68] sm:$0xf0] }
  0x42   : > { %752 = vmatpush.bf16.msra.mxu0 %v1576_v10  ;;  %1691 = vmatpush.bf16.msra.mxu2 %v1576_v10  ;;  %v1382_v10 = vor.u32 %v1550_v4, %v1379_v5  ;;  %v1454_v23 = vor.u32 %v1568_v18, %v1451_v19  ;;  %v1570_v30 = vld [vmem:[%s2121_s14 + $0xe4] sm:$0xf]  ;;  %v1459_v31 = vld [vmem:[%s2121_s14 + $0xe8] sm:$0xf0]  ;;  %v1398_v34 = vor.u32 %v1554_v28, %v1395_v29  ;;  %v1556_v40 = vld [vmem:[%s2121_s14 + $0x74] sm:$0xf] }
  0x43   : > { %841 = vmatpush.bf16.msra.mxu1 %v1584_v11  ;;  %1699 = vmatpush.bf16.msra.mxu3 %v1584_v11  ;;  %v1446_v11 = vor.u32 %v1566_v6, %v1443_v7  ;;  %v1462_v35 = vor.u32 %v1570_v30, %v1459_v31  ;;  %v1403_v41 = vld [vmem:[%s2121_s14 + $0x78] sm:$0xf0]  ;;  %v1572_v42 = vld [vmem:[%s2121_s14 + $0xf4] sm:$0xf]  ;;  %v2204_v55 = vld [vmem:[%s2331_s5] ss:$0 sm:$0xff] }
  0x44   : > { %v1467_v43 = vld [vmem:[%s2121_s14 + $0xf8] sm:$0xf0]  ;;  %v1406_v46 = vor.u32 %v1556_v40, %v1403_v41 }
  0x45   : > { %v1470_v47 = vor.u32 %v1572_v42, %v1467_v43 }
  0x46   : > { %753 = vmatpush.bf16.msra.mxu0 %v1575_v12  ;;  %1692 = vmatpush.bf16.msra.mxu2 %v1575_v12  ;;  %v1385_v12 = vld [vmem:[%s2121_s14 + $0x50] sm:$0xf] }
  0x47   : > { %842 = vmatpush.bf16.msra.mxu1 %v1583_v13  ;;  %1700 = vmatpush.bf16.msra.mxu3 %v1583_v13  ;;  %v1553_v13 = vld [vmem:[%s2121_s14 + $0x54] sm:$0xf0] }
  0x48   : > { %v1386_v20 = vor.u32 %v1553_v13, %v1385_v12 }
  0x4a   : > { %754 = vmatpush.bf16.msra.mxu0 %v1574_v14  ;;  %1693 = vmatpush.bf16.msra.mxu2 %v1574_v14  ;;  %v1449_v14 = vld [vmem:[%s2121_s14 + $0xd0] sm:$0xf] }
  0x4b   : > { %843 = vmatpush.bf16.msra.mxu1 %v1582_v15  ;;  %1701 = vmatpush.bf16.msra.mxu3 %v1582_v15  ;;  %v1569_v15 = vld [vmem:[%s2121_s14 + $0xd4] sm:$0xf0] }
  0x4c   : > { %v1450_v21 = vor.u32 %v1569_v15, %v1449_v14 }
  0x4d   : > { %755 = vmatmul.bf16.vlgmr.msra.gmra.mxu0 %v1346_v24  ;;  %795 = vmatmul.bf16.vlgmr.msra.gmra.mxu2 %v1410_v25  ;;  %v1393_v24 = vld [vmem:[%s2121_s14 + $0x60] sm:$0xf]  ;;  %v1555_v25 = vld [vmem:[%s2121_s14 + $0x64] sm:$0xf0] }
  0x4e   : > { %844 = vmatmul.bf16.vlgmr.msra.gmra.mxu1 %v1350_v26  ;;  %884 = vmatmul.bf16.vlgmr.msra.gmra.mxu3 %v1414_v27  ;;  %v1457_v26 = vld [vmem:[%s2121_s14 + $0xe0] sm:$0xf]  ;;  %v1571_v27 = vld [vmem:[%s2121_s14 + $0xe4] sm:$0xf0]  ;;  %v1394_v32 = vor.u32 %v1555_v25, %v1393_v24 }
  0x4f   : > { %v1458_v33 = vor.u32 %v1571_v27, %v1457_v26 }
  0x5d   : > { %760 = vmatmul.bf16.gmra.mxu0 %v1354_v36  ;;  %800 = vmatmul.bf16.gmra.mxu2 %v1418_v37  ;;  %v1401_v36 = vld [vmem:[%s2121_s14 + $0x70] sm:$0xf]  ;;  %v1557_v37 = vld [vmem:[%s2121_s14 + $0x74] sm:$0xf0] }
  0x5e   : > { %849 = vmatmul.bf16.gmra.mxu1 %v1358_v38  ;;  %889 = vmatmul.bf16.gmra.mxu3 %v1422_v39  ;;  %v1465_v38 = vld [vmem:[%s2121_s14 + $0xf0] sm:$0xf]  ;;  %v1573_v39 = vld [vmem:[%s2121_s14 + $0xf4] sm:$0xf0]  ;;  %v1402_v44 = vor.u32 %v1557_v37, %v1401_v36  ;;  %s1903_s14 = scalar_lea.hbm %s2332_s6, 1024 }
  0x5f   : > { %v1466_v45 = vor.u32 %v1573_v39, %v1465_v38  ;;  %p1905_p10 = scmp.lt.s32.totalorder %s1903_s14, %s1899_s29 }
  0x61   : > { %p1906_p11 = por %p1905_p10, %p1904_p9 }
  0x63   : > { %p1907_p12 = pnand %p1906_p11, %p1902_p8 }
  0x6d   : > { %765 = vmatmul.bf16.gmra.mxu0 %v1362_v48  ;;  %805 = vmatmul.bf16.gmra.mxu2 %v1426_v49 }
  0x6e   : > { %854 = vmatmul.bf16.gmra.mxu1 %v1366_v50  ;;  %894 = vmatmul.bf16.gmra.mxu3 %v1430_v51  ;;  %v2198_v51 = vld [vmem:[%s2330_s4] ss:$0 sm:$0xff] }
  0x7d   : > { %770 = vmatmul.bf16.gmra.mxu0 %v1370_v60  ;;  %810 = vmatmul.bf16.gmra.mxu2 %v1434_v61 }
  0x7e   : > { %859 = vmatmul.bf16.gmra.mxu1 %v1374_v62  ;;  %899 = vmatmul.bf16.gmra.mxu3 %v1438_v63 }
  0x8d   : > { %775 = vmatmul.bf16.gmra.mxu0 %v1378_v8  ;;  %815 = vmatmul.bf16.gmra.mxu2 %v1442_v9 }
  0x8e   : > { %864 = vmatmul.bf16.gmra.mxu1 %v1382_v10  ;;  %904 = vmatmul.bf16.gmra.mxu3 %v1446_v11 }
  0x9d   : > { %780 = vmatmul.bf16.gmra.mxu0 %v1386_v20  ;;  %820 = vmatmul.bf16.gmra.mxu2 %v1450_v21 }
  0x9e   : > { %869 = vmatmul.bf16.gmra.mxu1 %v1390_v22  ;;  %909 = vmatmul.bf16.gmra.mxu3 %v1454_v23 }
  0xad   : > { %785 = vmatmul.bf16.gmra.mxu0 %v1394_v32  ;;  %825 = vmatmul.bf16.gmra.mxu2 %v1458_v33 }
  0xae   : > { %874 = vmatmul.bf16.gmra.mxu1 %v1398_v34  ;;  %914 = vmatmul.bf16.gmra.mxu3 %v1462_v35 }
  0xbd   : > { %790 = vmatmul.bf16.gmra.mxu0 %v1402_v44  ;;  %830 = vmatmul.bf16.gmra.mxu2 %v1466_v45 }
  0xbe   : > { %879 = vmatmul.bf16.gmra.mxu1 %v1406_v46  ;;  %919 = vmatmul.bf16.gmra.mxu3 %v1470_v47 }
  0xca   : > { %v756_v48 = vpop.f32.mrf.mxu0 }
  0xcb   : > { %v845_v49 = vpop.f32.mrf.mxu1 }
  0xcc   : > { %v846_v50 = vadd.f32 %v845_v49, %v756_v48 }
  0xce   : > { %v1028_v54 = vmul.f32 %v2198_v51, %v846_v50 }
  0xd0   : > { %v796_v52 = vpop.f32.mrf.mxu2  ;;  %v1064_v60 = vadd.f32 %v2204_v55, %v1028_v54 }
  0xd1   : > { %v885_v53 = vpop.f32.mrf.mxu3 }
  0xd2   : > { %v758_v56 = vpop.f32.mrf.mxu0  ;;  %v886_v58 = vadd.f32 %v885_v53, %v796_v52  ;;  %v1096_v2 = vmax.f32 %v1064_v60, 0.0 }
  0xd3   : > { %v847_v57 = vpop.f32.mrf.mxu1 }
  0xd4   : > { %v848_v59 = vadd.f32 %v847_v57, %v758_v56  ;;  %v1044_v62 = vmul.f32 %v2198_v51, %v886_v58 }
  0xd6   : > { %v1029_v61 = vmul.f32 %v2198_v51, %v848_v59  ;;  %v1080_v7 = vadd.f32 %v2204_v55, %v1044_v62 }
  0xd8   : > { %v1065_v63 = vadd.f32 %v2204_v55, %v1029_v61  ;;  %v798_v0 = vpop.f32.mrf.mxu2  ;;  %v1112_v12 = vmax.f32 %v1080_v7, 0.0 }
  0xd9   : > { %v887_v1 = vpop.f32.mrf.mxu3 }
  0xda   : > { %v1097_v3 = vmax.f32 %v1065_v63, 0.0  ;;  %v888_v4 = vadd.f32 %v887_v1, %v798_v0  ;;  %v761_v5 = vpop.f32.mrf.mxu0 }
  0xdb   : > { %v850_v6 = vpop.f32.mrf.mxu1 }
  0xdc   : > { %v1594_v8 = vpack.c.bf16 %v1097_v3, %v1096_v2  ;;  %v1045_v9 = vmul.f32 %v2198_v51, %v888_v4  ;;  %v851_v11 = vadd.f32 %v850_v6, %v761_v5 }
  0xde   : > { %1595 = vst [vmem:[%s2213_s26] sm:$0xff] %v1594_v8   ;;  %v1081_v10 = vadd.f32 %v2204_v55, %v1045_v9  ;;  %v1030_v17 = vmul.f32 %v2198_v51, %v851_v11 }
  0xe0   : > { %v1113_v13 = vmax.f32 %v1081_v10, 0.0  ;;  %v801_v14 = vpop.f32.mrf.mxu2  ;;  %v1066_v22 = vadd.f32 %v2204_v55, %v1030_v17 }
  0xe1   : > { %v890_v15 = vpop.f32.mrf.mxu3 }
  0xe2   : > { %v1634_v16 = vpack.c.bf16 %v1113_v13, %v1112_v12  ;;  %v763_v18 = vpop.f32.mrf.mxu0  ;;  %v891_v20 = vadd.f32 %v890_v15, %v801_v14  ;;  %v1098_v28 = vmax.f32 %v1066_v22, 0.0 }
  0xe3   : > { %v852_v19 = vpop.f32.mrf.mxu1 }
  0xe4   : > { %1678 = vst [vmem:[%s2213_s26 + $0x40] sm:$0xff] %v1634_v16   ;;  %v853_v21 = vadd.f32 %v852_v19, %v763_v18  ;;  %v1046_v24 = vmul.f32 %v2198_v51, %v891_v20 }
  0xe6   : > { %v1031_v23 = vmul.f32 %v2198_v51, %v853_v21  ;;  %v1082_v33 = vadd.f32 %v2204_v55, %v1046_v24 }
  0xe8   : > { %v1067_v25 = vadd.f32 %v2204_v55, %v1031_v23  ;;  %v803_v26 = vpop.f32.mrf.mxu2  ;;  %v1114_v38 = vmax.f32 %v1082_v33, 0.0 }
  0xe9   : > { %v892_v27 = vpop.f32.mrf.mxu3 }
  0xea   : > { %v1099_v29 = vmax.f32 %v1067_v25, 0.0  ;;  %v893_v30 = vadd.f32 %v892_v27, %v803_v26  ;;  %v766_v31 = vpop.f32.mrf.mxu0 }
  0xeb   : > { %v855_v32 = vpop.f32.mrf.mxu1 }
  0xec   : > { %v1599_v34 = vpack.c.bf16 %v1099_v29, %v1098_v28  ;;  %v1047_v35 = vmul.f32 %v2198_v51, %v893_v30  ;;  %v856_v37 = vadd.f32 %v855_v32, %v766_v31 }
  0xee   : > { %1671 = vst [vmem:[%s2213_s26 + $0x8] sm:$0xff] %v1599_v34   ;;  %v1083_v36 = vadd.f32 %v2204_v55, %v1047_v35  ;;  %v1032_v43 = vmul.f32 %v2198_v51, %v856_v37 }
  0xf0   : > { %v1115_v39 = vmax.f32 %v1083_v36, 0.0  ;;  %v806_v40 = vpop.f32.mrf.mxu2  ;;  %v1068_v48 = vadd.f32 %v2204_v55, %v1032_v43 }
  0xf1   : > { %v895_v41 = vpop.f32.mrf.mxu3 }
  0xf2   : > { %v1639_v42 = vpack.c.bf16 %v1115_v39, %v1114_v38  ;;  %v768_v44 = vpop.f32.mrf.mxu0  ;;  %v896_v46 = vadd.f32 %v895_v41, %v806_v40  ;;  %v1100_v56 = vmax.f32 %v1068_v48, 0.0 }
  0xf3   : > { %v857_v45 = vpop.f32.mrf.mxu1 }
  0xf4   : > { %1679 = vst [vmem:[%s2213_s26 + $0x48] sm:$0xff] %v1639_v42   ;;  %v858_v47 = vadd.f32 %v857_v45, %v768_v44  ;;  %v1048_v50 = vmul.f32 %v2198_v51, %v896_v46 }
  0xf6   : > { %v1033_v49 = vmul.f32 %v2198_v51, %v858_v47  ;;  %v1084_v61 = vadd.f32 %v2204_v55, %v1048_v50 }
  0xf8   : > { %v1069_v52 = vadd.f32 %v2204_v55, %v1033_v49  ;;  %v808_v53 = vpop.f32.mrf.mxu2  ;;  %v1116_v2 = vmax.f32 %v1084_v61, 0.0 }
  0xf9   : > { %v897_v54 = vpop.f32.mrf.mxu3 }
  0xfa   : > { %v1101_v57 = vmax.f32 %v1069_v52, 0.0  ;;  %v898_v58 = vadd.f32 %v897_v54, %v808_v53  ;;  %v771_v59 = vpop.f32.mrf.mxu0 }
  0xfb   : > { %v860_v60 = vpop.f32.mrf.mxu1 }
  0xfc   : > { %v1604_v62 = vpack.c.bf16 %v1101_v57, %v1100_v56  ;;  %v1049_v63 = vmul.f32 %v2198_v51, %v898_v58  ;;  %v861_v1 = vadd.f32 %v860_v60, %v771_v59 }
  0xfe   : > { %1672 = vst [vmem:[%s2213_s26 + $0x10] sm:$0xff] %v1604_v62   ;;  %v1085_v0 = vadd.f32 %v2204_v55, %v1049_v63  ;;  %v1034_v7 = vmul.f32 %v2198_v51, %v861_v1 }
 0x100   : > { %v1117_v3 = vmax.f32 %v1085_v0, 0.0  ;;  %v811_v4 = vpop.f32.mrf.mxu2  ;;  %v1070_v12 = vadd.f32 %v2204_v55, %v1034_v7 }
 0x101   : > { %v900_v5 = vpop.f32.mrf.mxu3 }
 0x102   : > { %v1644_v6 = vpack.c.bf16 %v1117_v3, %v1116_v2  ;;  %v773_v8 = vpop.f32.mrf.mxu0  ;;  %v901_v10 = vadd.f32 %v900_v5, %v811_v4  ;;  %v1102_v18 = vmax.f32 %v1070_v12, 0.0 }
 0x103   : > { %v862_v9 = vpop.f32.mrf.mxu1 }
 0x104   : > { %1680 = vst [vmem:[%s2213_s26 + $0x50] sm:$0xff] %v1644_v6   ;;  %v863_v11 = vadd.f32 %v862_v9, %v773_v8  ;;  %v1050_v14 = vmul.f32 %v2198_v51, %v901_v10 }
 0x106   : > { %v1035_v13 = vmul.f32 %v2198_v51, %v863_v11  ;;  %v1086_v23 = vadd.f32 %v2204_v55, %v1050_v14 }
 0x108   : > { %v1071_v15 = vadd.f32 %v2204_v55, %v1035_v13  ;;  %v813_v16 = vpop.f32.mrf.mxu2  ;;  %v1118_v28 = vmax.f32 %v1086_v23, 0.0 }
 0x109   : > { %v902_v17 = vpop.f32.mrf.mxu3 }
 0x10a   : > { %v1103_v19 = vmax.f32 %v1071_v15, 0.0  ;;  %v903_v20 = vadd.f32 %v902_v17, %v813_v16  ;;  %v776_v21 = vpop.f32.mrf.mxu0 }
 0x10b   : > { %v865_v22 = vpop.f32.mrf.mxu1 }
 0x10c   : > { %v1609_v24 = vpack.c.bf16 %v1103_v19, %v1102_v18  ;;  %v1051_v25 = vmul.f32 %v2198_v51, %v903_v20  ;;  %v866_v27 = vadd.f32 %v865_v22, %v776_v21 }
 0x10e   : > { %1673 = vst [vmem:[%s2213_s26 + $0x18] sm:$0xff] %v1609_v24   ;;  %v1087_v26 = vadd.f32 %v2204_v55, %v1051_v25  ;;  %v1036_v33 = vmul.f32 %v2198_v51, %v866_v27 }
 0x110   : > { %v1119_v29 = vmax.f32 %v1087_v26, 0.0  ;;  %v816_v30 = vpop.f32.mrf.mxu2  ;;  %v1072_v38 = vadd.f32 %v2204_v55, %v1036_v33 }
 0x111   : > { %v905_v31 = vpop.f32.mrf.mxu3 }
 0x112   : > { %v1649_v32 = vpack.c.bf16 %v1119_v29, %v1118_v28  ;;  %v778_v34 = vpop.f32.mrf.mxu0  ;;  %v906_v36 = vadd.f32 %v905_v31, %v816_v30  ;;  %v1104_v44 = vmax.f32 %v1072_v38, 0.0 }
 0x113   : > { %v867_v35 = vpop.f32.mrf.mxu1 }
 0x114   : > { %1681 = vst [vmem:[%s2213_s26 + $0x58] sm:$0xff] %v1649_v32   ;;  %v868_v37 = vadd.f32 %v867_v35, %v778_v34  ;;  %v1052_v40 = vmul.f32 %v2198_v51, %v906_v36 }
 0x116   : > { %v1037_v39 = vmul.f32 %v2198_v51, %v868_v37  ;;  %v1088_v49 = vadd.f32 %v2204_v55, %v1052_v40 }
 0x118   : > { %v1073_v41 = vadd.f32 %v2204_v55, %v1037_v39  ;;  %v818_v42 = vpop.f32.mrf.mxu2  ;;  %v1120_v56 = vmax.f32 %v1088_v49, 0.0 }
 0x119   : > { %v907_v43 = vpop.f32.mrf.mxu3 }
 0x11a   : > { %v1105_v45 = vmax.f32 %v1073_v41, 0.0  ;;  %v908_v46 = vadd.f32 %v907_v43, %v818_v42  ;;  %v781_v47 = vpop.f32.mrf.mxu0 }
 0x11b   : > { %v870_v48 = vpop.f32.mrf.mxu1 }
 0x11c   : > { %v1614_v50 = vpack.c.bf16 %v1105_v45, %v1104_v44  ;;  %v1053_v52 = vmul.f32 %v2198_v51, %v908_v46  ;;  %v871_v54 = vadd.f32 %v870_v48, %v781_v47 }
 0x11e   : > { %1674 = vst [vmem:[%s2213_s26 + $0x20] sm:$0xff] %v1614_v50   ;;  %v1089_v53 = vadd.f32 %v2204_v55, %v1053_v52  ;;  %v1038_v61 = vmul.f32 %v2198_v51, %v871_v54 }
 0x120   : > { %v1121_v57 = vmax.f32 %v1089_v53, 0.0  ;;  %v821_v58 = vpop.f32.mrf.mxu2  ;;  %v1074_v2 = vadd.f32 %v2204_v55, %v1038_v61 }
 0x121   : > { %v910_v59 = vpop.f32.mrf.mxu3 }
 0x122   : > { %v1654_v60 = vpack.c.bf16 %v1121_v57, %v1120_v56  ;;  %v783_v62 = vpop.f32.mrf.mxu0  ;;  %v911_v0 = vadd.f32 %v910_v59, %v821_v58  ;;  %v1106_v8 = vmax.f32 %v1074_v2, 0.0 }
 0x123   : > { %v872_v63 = vpop.f32.mrf.mxu1 }
 0x124   : > { %1682 = vst [vmem:[%s2213_s26 + $0x60] sm:$0xff] %v1654_v60   ;;  %v873_v1 = vadd.f32 %v872_v63, %v783_v62  ;;  %v1054_v4 = vmul.f32 %v2198_v51, %v911_v0 }
 0x126   : > { %v1039_v3 = vmul.f32 %v2198_v51, %v873_v1  ;;  %v1090_v13 = vadd.f32 %v2204_v55, %v1054_v4 }
 0x128   : > { %v1075_v5 = vadd.f32 %v2204_v55, %v1039_v3  ;;  %v823_v6 = vpop.f32.mrf.mxu2  ;;  %v1122_v18 = vmax.f32 %v1090_v13, 0.0 }
 0x129   : > { %v912_v7 = vpop.f32.mrf.mxu3 }
 0x12a   : > { %v1107_v9 = vmax.f32 %v1075_v5, 0.0  ;;  %v913_v10 = vadd.f32 %v912_v7, %v823_v6  ;;  %v786_v11 = vpop.f32.mrf.mxu0 }
 0x12b   : > { %v875_v12 = vpop.f32.mrf.mxu1 }
 0x12c   : > { %v1619_v14 = vpack.c.bf16 %v1107_v9, %v1106_v8  ;;  %v1055_v15 = vmul.f32 %v2198_v51, %v913_v10  ;;  %v876_v17 = vadd.f32 %v875_v12, %v786_v11 }
 0x12e   : > { %1675 = vst [vmem:[%s2213_s26 + $0x28] sm:$0xff] %v1619_v14   ;;  %v1091_v16 = vadd.f32 %v2204_v55, %v1055_v15  ;;  %v1040_v23 = vmul.f32 %v2198_v51, %v876_v17 }
 0x130   : > { %v1123_v19 = vmax.f32 %v1091_v16, 0.0  ;;  %v826_v20 = vpop.f32.mrf.mxu2  ;;  %v1076_v28 = vadd.f32 %v2204_v55, %v1040_v23 }
 0x131   : > { %v915_v21 = vpop.f32.mrf.mxu3 }
 0x132   : > { %v1659_v22 = vpack.c.bf16 %v1123_v19, %v1122_v18  ;;  %v788_v24 = vpop.f32.mrf.mxu0  ;;  %v916_v26 = vadd.f32 %v915_v21, %v826_v20  ;;  %v1108_v34 = vmax.f32 %v1076_v28, 0.0 }
 0x133   : > { %v877_v25 = vpop.f32.mrf.mxu1 }
 0x134   : > { %1683 = vst [vmem:[%s2213_s26 + $0x68] sm:$0xff] %v1659_v22   ;;  %v878_v27 = vadd.f32 %v877_v25, %v788_v24  ;;  %v1056_v30 = vmul.f32 %v2198_v51, %v916_v26 }
 0x136   : > { %v1041_v29 = vmul.f32 %v2198_v51, %v878_v27  ;;  %v1092_v39 = vadd.f32 %v2204_v55, %v1056_v30 }
 0x138   : > { %v1077_v31 = vadd.f32 %v2204_v55, %v1041_v29  ;;  %v828_v32 = vpop.f32.mrf.mxu2  ;;  %v1124_v44 = vmax.f32 %v1092_v39, 0.0 }
 0x139   : > { %v917_v33 = vpop.f32.mrf.mxu3 }
 0x13a   : > { %v1109_v35 = vmax.f32 %v1077_v31, 0.0  ;;  %v918_v36 = vadd.f32 %v917_v33, %v828_v32  ;;  %v791_v37 = vpop.f32.mrf.mxu0 }
 0x13b   : > { %v880_v38 = vpop.f32.mrf.mxu1 }
 0x13c   : > { %v1624_v40 = vpack.c.bf16 %v1109_v35, %v1108_v34  ;;  %v1057_v41 = vmul.f32 %v2198_v51, %v918_v36  ;;  %v881_v43 = vadd.f32 %v880_v38, %v791_v37 }
 0x13e   : > { %1676 = vst [vmem:[%s2213_s26 + $0x30] sm:$0xff] %v1624_v40   ;;  %v1093_v42 = vadd.f32 %v2204_v55, %v1057_v41  ;;  %v1042_v49 = vmul.f32 %v2198_v51, %v881_v43 }
 0x140   : > { %v1125_v45 = vmax.f32 %v1093_v42, 0.0  ;;  %v831_v46 = vpop.f32.mrf.mxu2  ;;  %v1078_v56 = vadd.f32 %v2204_v55, %v1042_v49 }
 0x141   : > { %v920_v47 = vpop.f32.mrf.mxu3 }
 0x142   : > { %v1664_v48 = vpack.c.bf16 %v1125_v45, %v1124_v44  ;;  %v793_v50 = vpop.f32.mrf.mxu0  ;;  %v921_v53 = vadd.f32 %v920_v47, %v831_v46  ;;  %v1110_v62 = vmax.f32 %v1078_v56, 0.0 }
 0x143   : > { %v882_v52 = vpop.f32.mrf.mxu1 }
 0x144   : > { %1684 = vst [vmem:[%s2213_s26 + $0x70] sm:$0xff] %v1664_v48   ;;  %v883_v54 = vadd.f32 %v882_v52, %v793_v50  ;;  %v1058_v58 = vmul.f32 %v2198_v51, %v921_v53 }
 0x146   : > { %v1043_v57 = vmul.f32 %v2198_v51, %v883_v54  ;;  %v1094_v1 = vadd.f32 %v2204_v55, %v1058_v58 }
 0x148   : > { %v1079_v59 = vadd.f32 %v2204_v55, %v1043_v57  ;;  %v833_v60 = vpop.f32.mrf.mxu2  ;;  %v1126_v5 = vmax.f32 %v1094_v1, 0.0 }
 0x149   : > { %v922_v61 = vpop.f32.mrf.mxu3 }
 0x14a   : > { %v1111_v63 = vmax.f32 %v1079_v59, 0.0  ;;  %v923_v0 = vadd.f32 %v922_v61, %v833_v60 }
 0x14c   : > { %v1629_v2 = vpack.c.bf16 %v1111_v63, %v1110_v62  ;;  %v1059_v3 = vmul.f32 %v2198_v51, %v923_v0 }
 0x14e   : > { %1677 = vst [vmem:[%s2213_s26 + $0x38] sm:$0xff] %v1629_v2   ;;  %v1095_v4 = vadd.f32 %v2204_v55, %v1059_v3 }
 0x150   : > { %v1127_v6 = vmax.f32 %v1095_v4, 0.0 }
 0x152   : > { %v1669_v7 = vpack.c.bf16 %v1127_v6, %v1126_v5 }
 0x154   : > { %1685 = vst [vmem:[%s2213_s26 + $0x78] sm:$0xff] %v1669_v7  }
 0x155   : > { %1910 = shalt.err (!%p1907_p12)
}
 0x156   : > { %s1977_s27 = smov 64   ;;  %s1978_s28 = smov 4  }
 0x157   : > { %1712 = dma.vmem_to_hbm [thread:$0]  (%p2096_p5), %s1206_s3, 2048, %s1208_s18, %s1193_s19, %s1977_s27, %s1977_s27, %s1978_s28  }
 0x158 PF: > { %p1734_p13 = scmp.ge.s32.totalorder %s1969_s25, 2  ;;  %s1222_s30 = sand.u32 1, %s1949_s21  }
 0x159   : > { %s1223_s11 = scalar_lea.sflag [#allocation5], %s1222_s30 }
 0x15a   : > { %p1726_p0 = pnand %p1734_p13, %p2063_p6 }
 0x15c   : > { %p1727_p3 = pneg %p1726_p0 }
 0x15e   : > { %1944 = dma.done.wait (%p1727_p3), %s1223_s11, 2048  }
 0x15f   : > { %1946 = vsyncadd (%p1727_p3), %s1223_s11, 4294965248  ;;  %s23_s25 = sadd.s32 1, %s1969_s25   ;;  %s2346_s9 = sld [smem:[#allocation13_spill]] }
 0x160   : > { %p20_p7 = scmp.ge.s32.totalorder %s23_s25, 10   ;;  %s2347_s21 = smov %s1953_s22 }
 0x161   : > { %s2348_s22 = smov %s1957_s23  ;;  %s2349_s23 = smov %s2105_s15 }
 0x162   : > { %s2350_s3 = smov %s1965_s24  ;;  %22 = sbr.rel (!%p20_p7) target bundleno = 10 (0xa), region = 110 }
 0x165   : > { %s2351_s24 = smov %s2346_s9 }
 0x167   :  { %1229 = vsyncpa [#allocation4], 1 }
 0x168   :  { %1231 = vsyncpa [#allocation4 + $0x1], 1 }
 0x169   :  { %1232 = vsyncpa [#allocation7], 1 }
 0x16a   :  { %1233 = vsyncpa [#allocation5], 1 }
 0x16b   :  { %1235 = vsyncpa [#allocation5 + $0x1], 1 }

</bundles_post_ra>
